<compile_context>
chip_gen: v7x
topology: tpu7x:2x2x1
jax: 0.10.0
libtpu: 0.0.40
codegen_flags: <defaults>
</compile_context>

<pallas_src>
import functools

import jax
import jax.numpy as jnp
from jax.experimental import pallas as pl
from jax.experimental.pallas import tpu as pltpu

LN_EPS = 1e-5          # nn.LayerNorm default
LEAKY_SLOPE = 0.01     # nn.LeakyReLU default negative_slope


def _cdiv(a, b):
    return (a + b - 1) // b


def _round_up(n, m):
    return _cdiv(n, m) * m


def _layernorm_masked_f32(h, gamma, beta, d_true):
    """LayerNorm over the last axis, using only the first `d_true` lanes.

    Deviation form (reuse h - mean): one subtraction sweep, two reduces.
    When the tensor is unpadded (d_true == lane count) the mask is elided.
    """
    d_pad = h.shape[-1]
    if d_true == d_pad:
        mean = jnp.mean(h, axis=-1, keepdims=True)
        dev = h - mean
        var = jnp.mean(dev * dev, axis=-1, keepdims=True)
    else:
        lane = jax.lax.broadcasted_iota(jnp.int32, h.shape, h.ndim - 1)
        mask = lane < d_true
        inv_n = 1.0 / float(d_true)
        mean = jnp.sum(jnp.where(mask, h, 0.0), axis=-1, keepdims=True) * inv_n
        dev = jnp.where(mask, h - mean, 0.0)
        var = jnp.sum(dev * dev, axis=-1, keepdims=True) * inv_n
    return dev * jax.lax.rsqrt(var + LN_EPS) * gamma + beta


def residual_block_kernel(x_ref, w1_ref, b1_ref, g1_ref, be1_ref,
                          w2_ref, b2_ref, g2_ref, be2_ref, o_ref, *, d_true):
    x = x_ref[...].astype(jnp.float32)

    # Linear 1: weights already transposed to (D_in, D_out) in the wrapper,
    # so the MXU consumes them natively (no in-kernel relayout).
    h = jnp.dot(x.astype(w1_ref.dtype), w1_ref[...],
                preferred_element_type=jnp.float32) + b1_ref[...]
    # LayerNorm 1 (f32, lane-masked over the true feature dim)
    h = _layernorm_masked_f32(h, g1_ref[...], be1_ref[...], d_true)
    # LeakyReLU (f32)
    h = jnp.where(h > 0, h, LEAKY_SLOPE * h)
    # Linear 2
    h = jnp.dot(h.astype(w2_ref.dtype), w2_ref[...],
                preferred_element_type=jnp.float32) + b2_ref[...]
    # LayerNorm 2 (f32)
    h = _layernorm_masked_f32(h, g2_ref[...], be2_ref[...], d_true)

    # Residual add (padded lanes of x and h are both 0, so they stay 0).
    o_ref[...] = (x + h).astype(o_ref.dtype)


def _vmem_capacity_bytes():
    """Per-core VMEM capacity; conservative 64 MiB (v7x) fallback."""
    try:
        cap = getattr(pltpu.get_tpu_info(), "vmem_capacity_bytes", None)
        if cap:
            return int(cap)
    except Exception:
        pass
    return 64 * 1024 * 1024


def _choose_tiling(B, tb_target):
    """Roughly-equal 8-aligned batch tiles; minimal pad waste; >=2 steps for large B."""
    B8 = _round_up(max(B, 1), 8)
    n = _cdiv(B8, max(int(tb_target), 8))
    # v7x has 2 TensorCores: give the parallel batch axis at least two grid
    # steps once the batch is big enough that halving the tile keeps the MXU
    # M dimension reasonably full.
    if n == 1 and B8 >= 256:
        n = 2
    tb = _round_up(_cdiv(B8, n), 8)
    return tb, n * tb


def _const_spec(shape, single_buffer):
    """BlockSpec for a grid-invariant operand (constant index_map)."""
    index_map = lambda i: (0,) * len(shape)
    if single_buffer:
        # Single pipeline buffer: the block never changes, so double-buffering
        # it is pure VMEM waste.
        return pl.BlockSpec(shape, index_map, pipeline_mode=pl.Buffered(1))
    return pl.BlockSpec(shape, index_map)


def residual_block(x, params, *, tb=512, matmul_dtype=jnp.bfloat16, out_dtype=None):
    """x: (B, D) float32.  params: PyTorch-layout dict (w: (D_out, D_in)).

    tb: target batch tile (rows per grid step).  Sweep ~128-256 on v5e,
        256-1024 on v6e, 256-512 on v7x; the actual tile is derived from B.
    matmul_dtype: MXU operand dtype (bf16 fast path or f32 exact).
    out_dtype: output dtype (default: x.dtype).  bf16 halves output HBM
        traffic in the small-D memory-bound regime.
    """
    B, D = x.shape
    out_dtype = x.dtype if out_dtype is None else out_dtype

    # Pad the feature dim to a lane-dense multiple of 128 and pick batch tiles.
    D_pad = _round_up(D, 128)
    tb, B_pad = _choose_tiling(B, tb)
    n_tiles = B_pad // tb

    x_in = x
    if B_pad != B or D_pad != D:
        x_in = jnp.pad(x, ((0, B_pad - B), (0, D_pad - D)))

    # Hoist the (D_out, D_in) -> (D_in, D_out) transpose, the zero-padding and
    # the matmul-dtype cast out of the kernel (one-time XLA ops; bf16 also
    # halves weight DMA).  Zero padding keeps padded lanes identically zero.
    def padw(w):
        wt = w.T.astype(jnp.float32)
        if D_pad != D:
            wt = jnp.pad(wt, ((0, D_pad - D), (0, D_pad - D)))
        return wt.astype(matmul_dtype)

    def padv(v):
        v = v.reshape(1, D).astype(jnp.float32)
        if D_pad != D:
            v = jnp.pad(v, ((0, 0), (0, D_pad - D)))
        return v

    w1 = padw(params["w1"])
    w2 = padw(params["w2"])
    b1, g1, be1 = padv(params["b1"]), padv(params["g1"]), padv(params["be1"])
    b2, g2, be2 = padv(params["b2"]), padv(params["g2"]), padv(params["be2"])

    kernel = functools.partial(residual_block_kernel, d_true=D)
    row_spec = pl.BlockSpec((tb, D_pad), lambda i: (i, 0))
    w_itemsize = jnp.dtype(matmul_dtype).itemsize
    vmem_cap = _vmem_capacity_bytes()

    def _run(single_buffer_consts):
        nbuf = 1 if single_buffer_consts else 2
        w_spec = _const_spec((D_pad, D_pad), single_buffer_consts)
        v_spec = _const_spec((1, D_pad), single_buffer_consts)

        # VMEM estimate (double-buffering already counted per spec); ~15%
        # headroom below the physical per-core capacity of this generation.
        need = (2 * 2 * tb * D_pad * 4                     # x + out tiles, 2x buffered f32
                + nbuf * 2 * D_pad * D_pad * w_itemsize    # two weight blocks
                + nbuf * 6 * D_pad * 4                     # bias / gamma / beta vectors
                + 4 * tb * D_pad * 4)                      # in-kernel f32 intermediates
        vmem_limit = int(min(0.85 * vmem_cap,
                             max(1.25 * need, 32 * 1024 * 1024)))

        return pl.pallas_call(
            kernel,
            out_shape=jax.ShapeDtypeStruct((B_pad, D_pad), out_dtype),
            grid_spec=pltpu.PrefetchScalarGridSpec(
                num_scalar_prefetch=0,
                grid=(n_tiles,),
                in_specs=[row_spec,
                          w_spec, v_spec, v_spec, v_spec,
                          w_spec, v_spec, v_spec, v_spec],
                out_specs=row_spec,
            ),
            compiler_params=pltpu.CompilerParams(
                dimension_semantics=("parallel",),
                vmem_limit_bytes=vmem_limit),
        )(x_in, w1, b1, g1, be1, w2, b2, g2, be2)

    try:
        out = _run(True)
    except Exception:
        # pipeline_mode=pl.Buffered(1) unsupported on this jax build / backend:
        # fall back to default double-buffered constant specs (correct, just
        # uses more VMEM).
        out = _run(False)

    if B_pad != B or D_pad != D:
        out = out[:B, :D]
    return out


def init_params(key, dim):
    """nn.Linear default init U(-1/sqrt(dim), 1/sqrt(dim)); LayerNorm gamma=1, beta=0."""
    k1, k2, k3, k4 = jax.random.split(key, 4)
    bound = 1.0 / jnp.sqrt(dim)
    return {
        "w1": jax.random.uniform(k1, (dim, dim), jnp.float32, -bound, bound),
        "b1": jax.random.uniform(k2, (1, dim), jnp.float32, -bound, bound),
        "g1": jnp.ones((1, dim), jnp.float32),
        "be1": jnp.zeros((1, dim), jnp.float32),
        "w2": jax.random.uniform(k3, (dim, dim), jnp.float32, -bound, bound),
        "b2": jax.random.uniform(k4, (1, dim), jnp.float32, -bound, bound),
        "g2": jnp.ones((1, dim), jnp.float32),
        "be2": jnp.zeros((1, dim), jnp.float32),
    }


def residual_block_ref(x, p):
    """Pure-JAX reference mirroring the PyTorch forward."""
    D = x.shape[-1]
    h = x @ p["w1"].T + p["b1"]
    h = _layernorm_masked_f32(h, p["g1"], p["be1"], D)
    h = jnp.where(h > 0, h, LEAKY_SLOPE * h)
    h = h @ p["w2"].T + p["b2"]
    h = _layernorm_masked_f32(h, p["g2"], p["be2"], D)
    return x + h


if __name__ == "__main__":
    key = jax.random.PRNGKey(0)
    kx, kp = jax.random.split(key)

    B, D = 16, 32
    x = jax.random.normal(kx, (B, D), jnp.float32)
    params = init_params(kp, D)

    ref = residual_block_ref(x, params)

    # Exact (f32 MXU) path -- also exercises the D-padding + masked LayerNorm.
    out_f32 = jax.block_until_ready(
        residual_block(x, params, matmul_dtype=jnp.float32))
    assert out_f32.shape == (B, D)
    assert jnp.allclose(out_f32, ref, atol=1e-4, rtol=1e-4), "f32 mismatch vs reference"

    # bf16 MXU fast path; looser tolerance for bf16 operands (deliberate
    # accuracy/perf trade-off: x and W are bf16-rounded before the MXU).
    out_bf16 = jax.block_until_ready(
        residual_block(x, params, matmul_dtype=jnp.bfloat16))
    assert out_bf16.shape == (B, D)
    assert jnp.allclose(out_bf16, ref, atol=5e-2, rtol=5e-2), "bf16 mismatch vs reference"

    print("KERNEL_OK")
</pallas_src>

<mosaic_0001>
module attributes {stable_mosaic.version = 11 : i64} {
  func.func @residual_block_kernel(%arg0: i32, %arg1: memref<16x128xf32, #tpu.memory_space<vmem>>, %arg2: memref<128x128xf32, #tpu.memory_space<vmem>>, %arg3: memref<1x128xf32, #tpu.memory_space<vmem>>, %arg4: memref<1x128xf32, #tpu.memory_space<vmem>>, %arg5: memref<1x128xf32, #tpu.memory_space<vmem>>, %arg6: memref<128x128xf32, #tpu.memory_space<vmem>>, %arg7: memref<1x128xf32, #tpu.memory_space<vmem>>, %arg8: memref<1x128xf32, #tpu.memory_space<vmem>>, %arg9: memref<1x128xf32, #tpu.memory_space<vmem>>, %arg10: memref<16x128xf32, #tpu.memory_space<vmem>>) attributes {dimension_semantics = [#tpu.dimension_semantics<parallel>], iteration_bounds = array<i64: 1>, scalar_prefetch = 0 : i64, scratch_operands = 0 : i64, tpu.core_type = #tpu.core_type<tc>, window_params = [{transform_indices = @transform_0, window_bounds = array<i64: 16, 128>}, {pipeline_mode = #tpu.pipeline_mode<synchronous>, transform_indices = @transform_1, window_bounds = array<i64: 128, 128>}, {pipeline_mode = #tpu.pipeline_mode<synchronous>, transform_indices = @transform_2, window_bounds = array<i64: 1, 128>}, {pipeline_mode = #tpu.pipeline_mode<synchronous>, transform_indices = @transform_3, window_bounds = array<i64: 1, 128>}, {pipeline_mode = #tpu.pipeline_mode<synchronous>, transform_indices = @transform_4, window_bounds = array<i64: 1, 128>}, {pipeline_mode = #tpu.pipeline_mode<synchronous>, transform_indices = @transform_5, window_bounds = array<i64: 128, 128>}, {pipeline_mode = #tpu.pipeline_mode<synchronous>, transform_indices = @transform_6, window_bounds = array<i64: 1, 128>}, {pipeline_mode = #tpu.pipeline_mode<synchronous>, transform_indices = @transform_7, window_bounds = array<i64: 1, 128>}, {pipeline_mode = #tpu.pipeline_mode<synchronous>, transform_indices = @transform_8, window_bounds = array<i64: 1, 128>}, {transform_indices = @transform_9, window_bounds = array<i64: 16, 128>}]} {
    %c0 = arith.constant 0 : index
    %c0_0 = arith.constant 0 : index
    %0 = vector.load %arg1[%c0, %c0_0] : memref<16x128xf32, #tpu.memory_space<vmem>>, vector<16x128xf32>
    %c0_1 = arith.constant 0 : index
    %c0_2 = arith.constant 0 : index
    %1 = vector.load %arg2[%c0_1, %c0_2] : memref<128x128xf32, #tpu.memory_space<vmem>>, vector<128x128xf32>
    %cst = arith.constant dense<0.000000e+00> : vector<16x128xf32>
    %2 = tpu.matmul %0, %1, %cst {dimension_numbers = #tpu.dot_dimension_numbers<[1], [0], [0], [1], [0, 0, 1, 1], [], []>} : vector<16x128xf32>, vector<128x128xf32>, vector<16x128xf32> -> vector<16x128xf32>
    %c0_3 = arith.constant 0 : index
    %c0_4 = arith.constant 0 : index
    %3 = vector.load %arg3[%c0_3, %c0_4] : memref<1x128xf32, #tpu.memory_space<vmem>>, vector<1x128xf32>
    %4 = vector.broadcast %3 : vector<1x128xf32> to vector<16x128xf32>
    %5 = arith.addf %2, %4 : vector<16x128xf32>
    %c0_5 = arith.constant 0 : index
    %c0_6 = arith.constant 0 : index
    %6 = vector.load %arg4[%c0_5, %c0_6] : memref<1x128xf32, #tpu.memory_space<vmem>>, vector<1x128xf32>
    %c0_7 = arith.constant 0 : index
    %c0_8 = arith.constant 0 : index
    %7 = vector.load %arg5[%c0_7, %c0_8] : memref<1x128xf32, #tpu.memory_space<vmem>>, vector<1x128xf32>
    %8 = tpu.iota {dimensions = array<i32: 1>} : vector<16x128xi32>
    %c32_i32 = arith.constant 32 : i32
    %9 = vector.broadcast %c32_i32 : i32 to vector<16x128xi32>
    %10 = arith.cmpi slt, %8, %9 : vector<16x128xi32>
    %cst_9 = arith.constant 0.000000e+00 : f32
    %11 = vector.broadcast %cst_9 : f32 to vector<16x128xf32>
    %12 = arith.select %10, %5, %11 : vector<16x128xi1>, vector<16x128xf32>
    %cst_10 = arith.constant dense<0.000000e+00> : vector<16xf32>
    %13 = vector.multi_reduction <add>, %12, %cst_10 [1] : vector<16x128xf32> to vector<16xf32>
    %14 = vector.shape_cast %13 : vector<16xf32> to vector<16x1xf32>
    %cst_11 = arith.constant 3.125000e-02 : f32
    %15 = vector.broadcast %cst_11 : f32 to vector<16x1xf32>
    %16 = arith.mulf %14, %15 : vector<16x1xf32>
    %17 = vector.broadcast %16 : vector<16x1xf32> to vector<16x128xf32>
    %18 = arith.subf %5, %17 : vector<16x128xf32>
    %cst_12 = arith.constant 0.000000e+00 : f32
    %19 = vector.broadcast %cst_12 : f32 to vector<16x128xf32>
    %20 = arith.select %10, %18, %19 : vector<16x128xi1>, vector<16x128xf32>
    %21 = arith.mulf %20, %20 : vector<16x128xf32>
    %cst_13 = arith.constant dense<0.000000e+00> : vector<16xf32>
    %22 = vector.multi_reduction <add>, %21, %cst_13 [1] : vector<16x128xf32> to vector<16xf32>
    %23 = vector.shape_cast %22 : vector<16xf32> to vector<16x1xf32>
    %cst_14 = arith.constant 3.125000e-02 : f32
    %24 = vector.broadcast %cst_14 : f32 to vector<16x1xf32>
    %25 = arith.mulf %23, %24 : vector<16x1xf32>
    %cst_15 = arith.constant 9.99999974E-6 : f32
    %26 = vector.broadcast %cst_15 : f32 to vector<16x1xf32>
    %27 = arith.addf %25, %26 : vector<16x1xf32>
    %28 = math.rsqrt %27 : vector<16x1xf32>
    %29 = vector.broadcast %28 : vector<16x1xf32> to vector<16x128xf32>
    %30 = arith.mulf %20, %29 : vector<16x128xf32>
    %31 = vector.broadcast %6 : vector<1x128xf32> to vector<16x128xf32>
    %32 = arith.mulf %30, %31 : vector<16x128xf32>
    %33 = vector.broadcast %7 : vector<1x128xf32> to vector<16x128xf32>
    %34 = arith.addf %32, %33 : vector<16x128xf32>
    %cst_16 = arith.constant 0.000000e+00 : f32
    %35 = vector.broadcast %cst_16 : f32 to vector<16x128xf32>
    %36 = arith.cmpf ogt, %34, %35 : vector<16x128xf32>
    %cst_17 = arith.constant 0.00999999977 : f32
    %37 = vector.broadcast %cst_17 : f32 to vector<16x128xf32>
    %38 = arith.mulf %37, %34 : vector<16x128xf32>
    %39 = arith.select %36, %34, %38 : vector<16x128xi1>, vector<16x128xf32>
    %c0_18 = arith.constant 0 : index
    %c0_19 = arith.constant 0 : index
    %40 = vector.load %arg6[%c0_18, %c0_19] : memref<128x128xf32, #tpu.memory_space<vmem>>, vector<128x128xf32>
    %cst_20 = arith.constant dense<0.000000e+00> : vector<16x128xf32>
    %41 = tpu.matmul %39, %40, %cst_20 {dimension_numbers = #tpu.dot_dimension_numbers<[1], [0], [0], [1], [0, 0, 1, 1], [], []>} : vector<16x128xf32>, vector<128x128xf32>, vector<16x128xf32> -> vector<16x128xf32>
    %c0_21 = arith.constant 0 : index
    %c0_22 = arith.constant 0 : index
    %42 = vector.load %arg7[%c0_21, %c0_22] : memref<1x128xf32, #tpu.memory_space<vmem>>, vector<1x128xf32>
    %43 = vector.broadcast %42 : vector<1x128xf32> to vector<16x128xf32>
    %44 = arith.addf %41, %43 : vector<16x128xf32>
    %c0_23 = arith.constant 0 : index
    %c0_24 = arith.constant 0 : index
    %45 = vector.load %arg8[%c0_23, %c0_24] : memref<1x128xf32, #tpu.memory_space<vmem>>, vector<1x128xf32>
    %c0_25 = arith.constant 0 : index
    %c0_26 = arith.constant 0 : index
    %46 = vector.load %arg9[%c0_25, %c0_26] : memref<1x128xf32, #tpu.memory_space<vmem>>, vector<1x128xf32>
    %47 = tpu.iota {dimensions = array<i32: 1>} : vector<16x128xi32>
    %c32_i32_27 = arith.constant 32 : i32
    %48 = vector.broadcast %c32_i32_27 : i32 to vector<16x128xi32>
    %49 = arith.cmpi slt, %47, %48 : vector<16x128xi32>
    %cst_28 = arith.constant 0.000000e+00 : f32
    %50 = vector.broadcast %cst_28 : f32 to vector<16x128xf32>
    %51 = arith.select %49, %44, %50 : vector<16x128xi1>, vector<16x128xf32>
    %cst_29 = arith.constant dense<0.000000e+00> : vector<16xf32>
    %52 = vector.multi_reduction <add>, %51, %cst_29 [1] : vector<16x128xf32> to vector<16xf32>
    %53 = vector.shape_cast %52 : vector<16xf32> to vector<16x1xf32>
    %cst_30 = arith.constant 3.125000e-02 : f32
    %54 = vector.broadcast %cst_30 : f32 to vector<16x1xf32>
    %55 = arith.mulf %53, %54 : vector<16x1xf32>
    %56 = vector.broadcast %55 : vector<16x1xf32> to vector<16x128xf32>
    %57 = arith.subf %44, %56 : vector<16x128xf32>
    %cst_31 = arith.constant 0.000000e+00 : f32
    %58 = vector.broadcast %cst_31 : f32 to vector<16x128xf32>
    %59 = arith.select %49, %57, %58 : vector<16x128xi1>, vector<16x128xf32>
    %60 = arith.mulf %59, %59 : vector<16x128xf32>
    %cst_32 = arith.constant dense<0.000000e+00> : vector<16xf32>
    %61 = vector.multi_reduction <add>, %60, %cst_32 [1] : vector<16x128xf32> to vector<16xf32>
    %62 = vector.shape_cast %61 : vector<16xf32> to vector<16x1xf32>
    %cst_33 = arith.constant 3.125000e-02 : f32
    %63 = vector.broadcast %cst_33 : f32 to vector<16x1xf32>
    %64 = arith.mulf %62, %63 : vector<16x1xf32>
    %cst_34 = arith.constant 9.99999974E-6 : f32
    %65 = vector.broadcast %cst_34 : f32 to vector<16x1xf32>
    %66 = arith.addf %64, %65 : vector<16x1xf32>
    %67 = math.rsqrt %66 : vector<16x1xf32>
    %68 = vector.broadcast %67 : vector<16x1xf32> to vector<16x128xf32>
    %69 = arith.mulf %59, %68 : vector<16x128xf32>
    %70 = vector.broadcast %45 : vector<1x128xf32> to vector<16x128xf32>
    %71 = arith.mulf %69, %70 : vector<16x128xf32>
    %72 = vector.broadcast %46 : vector<1x128xf32> to vector<16x128xf32>
    %73 = arith.addf %71, %72 : vector<16x128xf32>
    %74 = arith.addf %0, %73 : vector<16x128xf32>
    %c0_35 = arith.constant 0 : index
    %c0_36 = arith.constant 0 : index
    %75 = vector.load %arg10[%c0_35, %c0_36] : memref<16x128xf32, #tpu.memory_space<vmem>>, vector<16x128xf32>
    tpu.vector_store %arg10[%c0_35, %c0_36], %74 {strides = array<i32>} : memref<16x128xf32, #tpu.memory_space<vmem>>, vector<16x128xf32>,
    return
  }
  func.func @transform_0(%arg0: i32) -> (i32, i32) {
    %c0_i32 = arith.constant 0 : i32
    %c0_i32_0 = arith.constant 0 : i32
    return %arg0, %c0_i32 : i32, i32
  }
  func.func @transform_1(%arg0: i32) -> (i32, i32) {
    %c0_i32 = arith.constant 0 : i32
    %c0_i32_0 = arith.constant 0 : i32
    %c0_i32_1 = arith.constant 0 : i32
    return %c0_i32, %c0_i32_0 : i32, i32
  }
  func.func @transform_2(%arg0: i32) -> (i32, i32) {
    %c0_i32 = arith.constant 0 : i32
    %c0_i32_0 = arith.constant 0 : i32
    %c0_i32_1 = arith.constant 0 : i32
    return %c0_i32, %c0_i32_0 : i32, i32
  }
  func.func @transform_3(%arg0: i32) -> (i32, i32) {
    %c0_i32 = arith.constant 0 : i32
    %c0_i32_0 = arith.constant 0 : i32
    %c0_i32_1 = arith.constant 0 : i32
    return %c0_i32, %c0_i32_0 : i32, i32
  }
  func.func @transform_4(%arg0: i32) -> (i32, i32) {
    %c0_i32 = arith.constant 0 : i32
    %c0_i32_0 = arith.constant 0 : i32
    %c0_i32_1 = arith.constant 0 : i32
    return %c0_i32, %c0_i32_0 : i32, i32
  }
  func.func @transform_5(%arg0: i32) -> (i32, i32) {
    %c0_i32 = arith.constant 0 : i32
    %c0_i32_0 = arith.constant 0 : i32
    %c0_i32_1 = arith.constant 0 : i32
    return %c0_i32, %c0_i32_0 : i32, i32
  }
  func.func @transform_6(%arg0: i32) -> (i32, i32) {
    %c0_i32 = arith.constant 0 : i32
    %c0_i32_0 = arith.constant 0 : i32
    %c0_i32_1 = arith.constant 0 : i32
    return %c0_i32, %c0_i32_0 : i32, i32
  }
  func.func @transform_7(%arg0: i32) -> (i32, i32) {
    %c0_i32 = arith.constant 0 : i32
    %c0_i32_0 = arith.constant 0 : i32
    %c0_i32_1 = arith.constant 0 : i32
    return %c0_i32, %c0_i32_0 : i32, i32
  }
  func.func @transform_8(%arg0: i32) -> (i32, i32) {
    %c0_i32 = arith.constant 0 : i32
    %c0_i32_0 = arith.constant 0 : i32
    %c0_i32_1 = arith.constant 0 : i32
    return %c0_i32, %c0_i32_0 : i32, i32
  }
  func.func @transform_9(%arg0: i32) -> (i32, i32) {
    %c0_i32 = arith.constant 0 : i32
    %c0_i32_0 = arith.constant 0 : i32
    return %arg0, %c0_i32 : i32, i32
  }
}

module attributes {stable_mosaic.version = 11 : i64} {
  func.func @residual_block_kernel(%arg0: i32, %arg1: memref<16x128xf32, #tpu.memory_space<vmem>>, %arg2: memref<128x128xf32, #tpu.memory_space<vmem>>, %arg3: memref<1x128xf32, #tpu.memory_space<vmem>>, %arg4: memref<1x128xf32, #tpu.memory_space<vmem>>, %arg5: memref<1x128xf32, #tpu.memory_space<vmem>>, %arg6: memref<128x128xf32, #tpu.memory_space<vmem>>, %arg7: memref<1x128xf32, #tpu.memory_space<vmem>>, %arg8: memref<1x128xf32, #tpu.memory_space<vmem>>, %arg9: memref<1x128xf32, #tpu.memory_space<vmem>>, %arg10: memref<16x128xf32, #tpu.memory_space<vmem>>) attributes {dimension_semantics = [#tpu.dimension_semantics<parallel>], iteration_bounds = array<i64: 1>, scalar_prefetch = 0 : i64, scratch_operands = 0 : i64, tpu.core_type = #tpu.core_type<tc>, window_params = [{transform_indices = @transform_0, window_bounds = array<i64: 16, 128>}, {pipeline_mode = #tpu.pipeline_mode<synchronous>, transform_indices = @transform_1, window_bounds = array<i64: 128, 128>}, {pipeline_mode = #tpu.pipeline_mode<synchronous>, transform_indices = @transform_2, window_bounds = array<i64: 1, 128>}, {pipeline_mode = #tpu.pipeline_mode<synchronous>, transform_indices = @transform_3, window_bounds = array<i64: 1, 128>}, {pipeline_mode = #tpu.pipeline_mode<synchronous>, transform_indices = @transform_4, window_bounds = array<i64: 1, 128>}, {pipeline_mode = #tpu.pipeline_mode<synchronous>, transform_indices = @transform_5, window_bounds = array<i64: 128, 128>}, {pipeline_mode = #tpu.pipeline_mode<synchronous>, transform_indices = @transform_6, window_bounds = array<i64: 1, 128>}, {pipeline_mode = #tpu.pipeline_mode<synchronous>, transform_indices = @transform_7, window_bounds = array<i64: 1, 128>}, {pipeline_mode = #tpu.pipeline_mode<synchronous>, transform_indices = @transform_8, window_bounds = array<i64: 1, 128>}, {transform_indices = @transform_9, window_bounds = array<i64: 16, 128>}]} {
    %c0 = arith.constant 0 : index
    %c0_0 = arith.constant 0 : index
    %0 = vector.load %arg1[%c0, %c0_0] : memref<16x128xf32, #tpu.memory_space<vmem>>, vector<16x128xf32>
    %c0_1 = arith.constant 0 : index
    %c0_2 = arith.constant 0 : index
    %1 = vector.load %arg2[%c0_1, %c0_2] : memref<128x128xf32, #tpu.memory_space<vmem>>, vector<128x128xf32>
    %cst = arith.constant dense<0.000000e+00> : vector<16x128xf32>
    %2 = tpu.matmul %0, %1, %cst {dimension_numbers = #tpu.dot_dimension_numbers<[1], [0], [0], [1], [0, 0, 1, 1], [], []>} : vector<16x128xf32>, vector<128x128xf32>, vector<16x128xf32> -> vector<16x128xf32>
    %c0_3 = arith.constant 0 : index
    %c0_4 = arith.constant 0 : index
    %3 = vector.load %arg3[%c0_3, %c0_4] : memref<1x128xf32, #tpu.memory_space<vmem>>, vector<1x128xf32>
    %4 = vector.broadcast %3 : vector<1x128xf32> to vector<16x128xf32>
    %5 = arith.addf %2, %4 : vector<16x128xf32>
    %c0_5 = arith.constant 0 : index
    %c0_6 = arith.constant 0 : index
    %6 = vector.load %arg4[%c0_5, %c0_6] : memref<1x128xf32, #tpu.memory_space<vmem>>, vector<1x128xf32>
    %c0_7 = arith.constant 0 : index
    %c0_8 = arith.constant 0 : index
    %7 = vector.load %arg5[%c0_7, %c0_8] : memref<1x128xf32, #tpu.memory_space<vmem>>, vector<1x128xf32>
    %8 = tpu.iota {dimensions = array<i32: 1>} : vector<16x128xi32>
    %c32_i32 = arith.constant 32 : i32
    %9 = vector.broadcast %c32_i32 : i32 to vector<16x128xi32>
    %10 = arith.cmpi slt, %8, %9 : vector<16x128xi32>
    %cst_9 = arith.constant 0.000000e+00 : f32
    %11 = vector.broadcast %cst_9 : f32 to vector<16x128xf32>
    %12 = arith.select %10, %5, %11 : vector<16x128xi1>, vector<16x128xf32>
    %cst_10 = arith.constant dense<0.000000e+00> : vector<16xf32>
    %13 = vector.multi_reduction <add>, %12, %cst_10 [1] : vector<16x128xf32> to vector<16xf32>
    %14 = vector.shape_cast %13 : vector<16xf32> to vector<16x1xf32>
    %cst_11 = arith.constant 3.125000e-02 : f32
    %15 = vector.broadcast %cst_11 : f32 to vector<16x1xf32>
    %16 = arith.mulf %14, %15 : vector<16x1xf32>
    %17 = vector.broadcast %16 : vector<16x1xf32> to vector<16x128xf32>
    %18 = arith.subf %5, %17 : vector<16x128xf32>
    %cst_12 = arith.constant 0.000000e+00 : f32
    %19 = vector.broadcast %cst_12 : f32 to vector<16x128xf32>
    %20 = arith.select %10, %18, %19 : vector<16x128xi1>, vector<16x128xf32>
    %21 = arith.mulf %20, %20 : vector<16x128xf32>
    %cst_13 = arith.constant dense<0.000000e+00> : vector<16xf32>
    %22 = vector.multi_reduction <add>, %21, %cst_13 [1] : vector<16x128xf32> to vector<16xf32>
    %23 = vector.shape_cast %22 : vector<16xf32> to vector<16x1xf32>
    %cst_14 = arith.constant 3.125000e-02 : f32
    %24 = vector.broadcast %cst_14 : f32 to vector<16x1xf32>
    %25 = arith.mulf %23, %24 : vector<16x1xf32>
    %cst_15 = arith.constant 9.99999974E-6 : f32
    %26 = vector.broadcast %cst_15 : f32 to vector<16x1xf32>
    %27 = arith.addf %25, %26 : vector<16x1xf32>
    %28 = math.rsqrt %27 : vector<16x1xf32>
    %29 = vector.broadcast %28 : vector<16x1xf32> to vector<16x128xf32>
    %30 = arith.mulf %20, %29 : vector<16x128xf32>
    %31 = vector.broadcast %6 : vector<1x128xf32> to vector<16x128xf32>
    %32 = arith.mulf %30, %31 : vector<16x128xf32>
    %33 = vector.broadcast %7 : vector<1x128xf32> to vector<16x128xf32>
    %34 = arith.addf %32, %33 : vector<16x128xf32>
    %cst_16 = arith.constant 0.000000e+00 : f32
    %35 = vector.broadcast %cst_16 : f32 to vector<16x128xf32>
    %36 = arith.cmpf ogt, %34, %35 : vector<16x128xf32>
    %cst_17 = arith.constant 0.00999999977 : f32
    %37 = vector.broadcast %cst_17 : f32 to vector<16x128xf32>
    %38 = arith.mulf %37, %34 : vector<16x128xf32>
    %39 = arith.select %36, %34, %38 : vector<16x128xi1>, vector<16x128xf32>
    %c0_18 = arith.constant 0 : index
    %c0_19 = arith.constant 0 : index
    %40 = vector.load %arg6[%c0_18, %c0_19] : memref<128x128xf32, #tpu.memory_space<vmem>>, vector<128x128xf32>
    %cst_20 = arith.constant dense<0.000000e+00> : vector<16x128xf32>
    %41 = tpu.matmul %39, %40, %cst_20 {dimension_numbers = #tpu.dot_dimension_numbers<[1], [0], [0], [1], [0, 0, 1, 1], [], []>} : vector<16x128xf32>, vector<128x128xf32>, vector<16x128xf32> -> vector<16x128xf32>
    %c0_21 = arith.constant 0 : index
    %c0_22 = arith.constant 0 : index
    %42 = vector.load %arg7[%c0_21, %c0_22] : memref<1x128xf32, #tpu.memory_space<vmem>>, vector<1x128xf32>
    %43 = vector.broadcast %42 : vector<1x128xf32> to vector<16x128xf32>
    %44 = arith.addf %41, %43 : vector<16x128xf32>
    %c0_23 = arith.constant 0 : index
    %c0_24 = arith.constant 0 : index
    %45 = vector.load %arg8[%c0_23, %c0_24] : memref<1x128xf32, #tpu.memory_space<vmem>>, vector<1x128xf32>
    %c0_25 = arith.constant 0 : index
    %c0_26 = arith.constant 0 : index
    %46 = vector.load %arg9[%c0_25, %c0_26] : memref<1x128xf32, #tpu.memory_space<vmem>>, vector<1x128xf32>
    %47 = tpu.iota {dimensions = array<i32: 1>} : vector<16x128xi32>
    %c32_i32_27 = arith.constant 32 : i32
    %48 = vector.broadcast %c32_i32_27 : i32 to vector<16x128xi32>
    %49 = arith.cmpi slt, %47, %48 : vector<16x128xi32>
    %cst_28 = arith.constant 0.000000e+00 : f32
    %50 = vector.broadcast %cst_28 : f32 to vector<16x128xf32>
    %51 = arith.select %49, %44, %50 : vector<16x128xi1>, vector<16x128xf32>
    %cst_29 = arith.constant dense<0.000000e+00> : vector<16xf32>
    %52 = vector.multi_reduction <add>, %51, %cst_29 [1] : vector<16x128xf32> to vector<16xf32>
    %53 = vector.shape_cast %52 : vector<16xf32> to vector<16x1xf32>
    %cst_30 = arith.constant 3.125000e-02 : f32
    %54 = vector.broadcast %cst_30 : f32 to vector<16x1xf32>
    %55 = arith.mulf %53, %54 : vector<16x1xf32>
    %56 = vector.broadcast %55 : vector<16x1xf32> to vector<16x128xf32>
    %57 = arith.subf %44, %56 : vector<16x128xf32>
    %cst_31 = arith.constant 0.000000e+00 : f32
    %58 = vector.broadcast %cst_31 : f32 to vector<16x128xf32>
    %59 = arith.select %49, %57, %58 : vector<16x128xi1>, vector<16x128xf32>
    %60 = arith.mulf %59, %59 : vector<16x128xf32>
    %cst_32 = arith.constant dense<0.000000e+00> : vector<16xf32>
    %61 = vector.multi_reduction <add>, %60, %cst_32 [1] : vector<16x128xf32> to vector<16xf32>
    %62 = vector.shape_cast %61 : vector<16xf32> to vector<16x1xf32>
    %cst_33 = arith.constant 3.125000e-02 : f32
    %63 = vector.broadcast %cst_33 : f32 to vector<16x1xf32>
    %64 = arith.mulf %62, %63 : vector<16x1xf32>
    %cst_34 = arith.constant 9.99999974E-6 : f32
    %65 = vector.broadcast %cst_34 : f32 to vector<16x1xf32>
    %66 = arith.addf %64, %65 : vector<16x1xf32>
    %67 = math.rsqrt %66 : vector<16x1xf32>
    %68 = vector.broadcast %67 : vector<16x1xf32> to vector<16x128xf32>
    %69 = arith.mulf %59, %68 : vector<16x128xf32>
    %70 = vector.broadcast %45 : vector<1x128xf32> to vector<16x128xf32>
    %71 = arith.mulf %69, %70 : vector<16x128xf32>
    %72 = vector.broadcast %46 : vector<1x128xf32> to vector<16x128xf32>
    %73 = arith.addf %71, %72 : vector<16x128xf32>
    %74 = arith.addf %0, %73 : vector<16x128xf32>
    %c0_35 = arith.constant 0 : index
    %c0_36 = arith.constant 0 : index
    %75 = vector.load %arg10[%c0_35, %c0_36] : memref<16x128xf32, #tpu.memory_space<vmem>>, vector<16x128xf32>
    tpu.vector_store %arg10[%c0_35, %c0_36], %74 {strides = array<i32>} : memref<16x128xf32, #tpu.memory_space<vmem>>, vector<16x128xf32>,
    return
  }
  func.func @transform_0(%arg0: i32) -> (i32, i32) {
    %c0_i32 = arith.constant 0 : i32
    %c0_i32_0 = arith.constant 0 : i32
    return %arg0, %c0_i32 : i32, i32
  }
  func.func @transform_1(%arg0: i32) -> (i32, i32) {
    %c0_i32 = arith.constant 0 : i32
    %c0_i32_0 = arith.constant 0 : i32
    %c0_i32_1 = arith.constant 0 : i32
    return %c0_i32, %c0_i32_0 : i32, i32
  }
  func.func @transform_2(%arg0: i32) -> (i32, i32) {
    %c0_i32 = arith.constant 0 : i32
    %c0_i32_0 = arith.constant 0 : i32
    %c0_i32_1 = arith.constant 0 : i32
    return %c0_i32, %c0_i32_0 : i32, i32
  }
  func.func @transform_3(%arg0: i32) -> (i32, i32) {
    %c0_i32 = arith.constant 0 : i32
    %c0_i32_0 = arith.constant 0 : i32
    %c0_i32_1 = arith.constant 0 : i32
    return %c0_i32, %c0_i32_0 : i32, i32
  }
  func.func @transform_4(%arg0: i32) -> (i32, i32) {
    %c0_i32 = arith.constant 0 : i32
    %c0_i32_0 = arith.constant 0 : i32
    %c0_i32_1 = arith.constant 0 : i32
    return %c0_i32, %c0_i32_0 : i32, i32
  }
  func.func @transform_5(%arg0: i32) -> (i32, i32) {
    %c0_i32 = arith.constant 0 : i32
    %c0_i32_0 = arith.constant 0 : i32
    %c0_i32_1 = arith.constant 0 : i32
    return %c0_i32, %c0_i32_0 : i32, i32
  }
  func.func @transform_6(%arg0: i32) -> (i32, i32) {
    %c0_i32 = arith.constant 0 : i32
    %c0_i32_0 = arith.constant 0 : i32
    %c0_i32_1 = arith.constant 0 : i32
    return %c0_i32, %c0_i32_0 : i32, i32
  }
  func.func @transform_7(%arg0: i32) -> (i32, i32) {
    %c0_i32 = arith.constant 0 : i32
    %c0_i32_0 = arith.constant 0 : i32
    %c0_i32_1 = arith.constant 0 : i32
    return %c0_i32, %c0_i32_0 : i32, i32
  }
  func.func @transform_8(%arg0: i32) -> (i32, i32) {
    %c0_i32 = arith.constant 0 : i32
    %c0_i32_0 = arith.constant 0 : i32
    %c0_i32_1 = arith.constant 0 : i32
    return %c0_i32, %c0_i32_0 : i32, i32
  }
  func.func @transform_9(%arg0: i32) -> (i32, i32) {
    %c0_i32 = arith.constant 0 : i32
    %c0_i32_0 = arith.constant 0 : i32
    return %arg0, %c0_i32 : i32, i32
  }
}

</mosaic_0001>

<bundles_post_ra>
// kernel: tpu_custom_call.1
= control target key start
LH: loop header
LB: loop body
LE: loop exit
PB: predicated region body
PF: predicated region fallthrough
CT: control target
= control target key end

     0   :  { %14 = vsyncpa [#allocation3], 0  ;;  %s843_s0 = inlined_call_operand.hbm [shape: f32[16,128], index: 0, kind: input, shape index: {}]   ;;  %s844_s1 = inlined_call_operand.hbm [shape: f32[128,128], index: 1, kind: input, shape index: {}]   ;;  %s845_s2 = inlined_call_operand.vmem [shape: f32[1,128], index: 2, kind: input, shape index: {}]   ;;  %s846_s3 = inlined_call_operand.vmem [shape: f32[1,128], index: 3, kind: input, shape index: {}]   ;;  %s847_s4 = inlined_call_operand.vmem [shape: f32[1,128], index: 4, kind: input, shape index: {}]   ;;  %s848_s5 = inlined_call_operand.hbm [shape: f32[128,128], index: 5, kind: input, shape index: {}]   ;;  %s849_s6 = inlined_call_operand.vmem [shape: f32[1,128], index: 6, kind: input, shape index: {}]   ;;  %s850_s7 = inlined_call_operand.vmem [shape: f32[1,128], index: 7, kind: input, shape index: {}]   ;;  %s851_s8 = inlined_call_operand.vmem [shape: f32[1,128], index: 8, kind: input, shape index: {}]   ;;  %s852_s9 = inlined_call_operand.hbm [shape: f32[16,128], index: 9, kind: output, shape index: {}]  }
   0x1   :  { %15 = vsyncpa [#allocation6], 0 }
   0x2   :  { %16 = vsyncpa [#allocation4], 0  ;;  %s675_s30 = smov [#allocation5]   ;;  %s676_s11 = smov [#allocation2]  }
   0x3   :  { %s34_s10 = sshll.u32 %s675_s30, 4  ;;  %s22_s12 = sshll.u32 %s676_s11, 4  ;;  %s35_s10 = int_to_ptr.vmem [resolvable:$true] %s34_s10  ;;  %s731_s12 = int_to_ptr.vmem [resolvable:$true] %s22_s12 }
   0x4   :  { %s581_s15 = scalar_lea.hbm %s844_s1, 2048 }
   0x5   :  { %p582_p0 = scmp.ne.s32.totalorder %s844_s1, %s581_s15  ;;  %p585_p1 = scmp.lt.u32.totalorder %s581_s15, %s844_s1 }
   0x7   :  { %p587_p2 = pnand %p585_p1, %p582_p0 }
   0x9   :  { %590 = shalt.err (!%p587_p2)
}
   0xa   :  { %s591_s20 = scalar_lea.vmem %s35_s10, 2048  ;;  %p596_p4 = scmp.lt.s32.totalorder %s35_s10, %s35_s10 }
   0xb   :  { %p592_p3 = scmp.ne.s32.totalorder %s35_s10, %s591_s20  ;;  %p597_p5 = scmp.lt.s32.totalorder %s591_s20, %s591_s20 }
   0xd   :  { %p598_p6 = por %p597_p5, %p596_p4 }
   0xf   :  { %p599_p7 = pnand %p598_p6, %p592_p3 }
  0x11   :  { %602 = shalt.err (!%p599_p7)
}
  0x12   :  { %s677_s21 = smov 128   ;;  %s678_s22 = smov 8  }
  0x13   :  { %40 = dma.hbm_to_vmem [thread:$0]  %s844_s1, 2048, %s35_s10, [#allocation6], %s677_s21, %s677_s21, %s678_s22  }
  0x14   :  { %s603_s27 = scalar_lea.hbm %s843_s0, 256 }
  0x15   :  { %p604_p8 = scmp.ne.s32.totalorder %s843_s0, %s603_s27  ;;  %p607_p9 = scmp.lt.u32.totalorder %s603_s27, %s843_s0 }
  0x17   :  { %p609_p10 = pnand %p607_p9, %p604_p8 }
  0x19   :  { %612 = shalt.err (!%p609_p10)
}
  0x1a   :  { %s613_s13 = scalar_lea.vmem %s731_s12, 256  ;;  %p618_p12 = scmp.lt.s32.totalorder %s731_s12, %s731_s12 }
  0x1b   :  { %p614_p11 = scmp.ne.s32.totalorder %s731_s12, %s613_s13  ;;  %p619_p13 = scmp.lt.s32.totalorder %s613_s13, %s613_s13 }
  0x1d   :  { %p620_p0 = por %p619_p13, %p618_p12 }
  0x1f   :  { %p621_p1 = pnand %p620_p0, %p614_p11 }
  0x21   :  { %624 = shalt.err (!%p621_p1)
}
  0x22   :  { %28 = dma.hbm_to_vmem [thread:$0]  %s843_s0, 256, %s731_s12, [#allocation3], %s677_s21, %s677_s21, %s678_s22  }
  0x23   :  { %s679_s14 = smov [#allocation7]   ;;  %s625_s18 = scalar_lea.hbm %s848_s5, 2048 }
  0x24   :  { %s52_s15 = sshll.u32 %s679_s14, 4  ;;  %p626_p2 = scmp.ne.s32.totalorder %s848_s5, %s625_s18  ;;  %s53_s15 = int_to_ptr.vmem [resolvable:$true] %s52_s15 }
  0x25   :  { %p629_p3 = scmp.lt.u32.totalorder %s625_s18, %s848_s5 }
  0x27   :  { %p631_p4 = pnand %p629_p3, %p626_p2 }
  0x29   :  { %634 = shalt.err (!%p631_p4)
}
  0x2a   :  { %s635_s25 = scalar_lea.vmem %s53_s15, 2048  ;;  %p640_p6 = scmp.lt.s32.totalorder %s53_s15, %s53_s15 }
  0x2b   :  { %p636_p5 = scmp.ne.s32.totalorder %s53_s15, %s635_s25  ;;  %p641_p7 = scmp.lt.s32.totalorder %s635_s25, %s635_s25 }
  0x2d   :  { %p642_p8 = por %p641_p7, %p640_p6 }
  0x2f   :  { %p643_p9 = pnand %p642_p8, %p636_p5 }
  0x31   :  { %646 = shalt.err (!%p643_p9)
}
  0x32   :  { %58 = dma.hbm_to_vmem [thread:$0]  %s848_s5, 2048, %s53_s15, [#allocation6], %s677_s21, %s677_s21, %s678_s22  }
  0x33   :  { %669 = dma.done.wait [#allocation3], 256  }
  0x34   :  { %670 = vsyncadd [#allocation3], 4294967040 }
  0x35   :  { %671 = dma.done.wait [#allocation6], 4096  }
  0x36   :  { %672 = vsyncadd [#allocation6], 4294963200  ;;  %v76_v0 = vld [vmem:[#allocation5] sm:$0xff]  ;;  %v77_v1 = vld [vmem:[#allocation5 + $0x8] sm:$0xff]  ;;  %v176_v26 = vlaneseq  ;;  %s680_s1 = smov [#allocation8]  }
  0x37   :  { %v78_v2 = vld [vmem:[#allocation5 + $0x10] sm:$0xff]  ;;  %v503_v3 = vpack.c.bf16 %v77_v1, %v76_v0  ;;  %v79_v4 = vld [vmem:[#allocation5 + $0x18] sm:$0xff]  ;;  %v80_v6 = vld [vmem:[#allocation5 + $0x20] sm:$0xff]  ;;  %s378_s10 = sshll.u32 %s680_s1, 4  ;;  %s379_s10 = int_to_ptr.vmem [resolvable:$true] %s378_s10 }
  0x38   :  { %v507_v5 = vpack.c.bf16 %v79_v4, %v78_v2  ;;  %v81_v7 = vld [vmem:[#allocation5 + $0x28] sm:$0xff]  ;;  %v783_v9 = vld [vmem:[#allocation2] sm:$0xff]  ;;  %v83_v11 = vld [vmem:[#allocation5 + $0x38] sm:$0xff]  ;;  %v789_v27 = vand.u32 127, %v176_v26  ;;  %p652_p11 = scmp.lt.s32.totalorder %s379_s10, %s379_s10 }
  0x39   :  { %504 = vmatprep.subr.bf16.mxu0 %v503_v3  ;;  %v511_v8 = vpack.c.bf16 %v81_v7, %v80_v6  ;;  %v82_v10 = vld [vmem:[#allocation5 + $0x30] sm:$0xff]  ;;  %465 = vmatprep.mubr.f32.mxu0 %v783_v9  ;;  %v84_v13 = vld [vmem:[#allocation5 + $0x40] sm:$0xff]  ;;  %v85_v14 = vld [vmem:[#allocation5 + $0x48] sm:$0xff] }
  0x3a   :  { %506 = vmatpush3.bf16.msra.mxu0 %v503_v3  ;;  %v515_v12 = vpack.c.bf16 %v83_v11, %v82_v10  ;;  %v519_v15 = vpack.c.bf16 %v85_v14, %v84_v13  ;;  %v86_v16 = vld [vmem:[#allocation5 + $0x50] sm:$0xff]  ;;  %v87_v17 = vld [vmem:[#allocation5 + $0x58] sm:$0xff]  ;;  %v88_v19 = vld [vmem:[#allocation5 + $0x60] sm:$0xff]  ;;  %vm178_vm0 = vcmp.lt.s32.totalorder %v789_v27, 32 }
  0x3b   :  { %508 = vmatprep.subr.bf16.mxu0 %v507_v5  ;;  %v523_v18 = vpack.c.bf16 %v87_v17, %v86_v16  ;;  %v89_v20 = vld [vmem:[#allocation5 + $0x68] sm:$0xff]  ;;  %v90_v22 = vld [vmem:[#allocation5 + $0x70] sm:$0xff]  ;;  %v91_v23 = vld [vmem:[#allocation5 + $0x78] sm:$0xff] }
  0x3c   :  { %v527_v21 = vpack.c.bf16 %v89_v20, %v88_v19  ;;  %v531_v24 = vpack.c.bf16 %v91_v23, %v90_v22  ;;  %v786_v25 = vld [vmem:[#allocation2 + $0x8] sm:$0xff]  ;;  %v391_v28 = vld [vmem:[%s845_s2] ss:$0 sm:$0xff]  ;;  %v227_v35 = vld [vmem:[#allocation7] sm:$0xff] }
  0x3d   :  { %v228_v36 = vld [vmem:[#allocation7 + $0x8] sm:$0xff]  ;;  %v229_v48 = vld [vmem:[#allocation7 + $0x10] sm:$0xff]  ;;  %v230_v49 = vld [vmem:[#allocation7 + $0x18] sm:$0xff] }
  0x3e   :  { %510 = vmatpush3.bf16.msra.mxu0 %v507_v5  ;;  %v535_v37 = vpack.c.bf16 %v228_v36, %v227_v35  ;;  %v539_v50 = vpack.c.bf16 %v230_v49, %v229_v48  ;;  %v231_v51 = vld [vmem:[#allocation7 + $0x20] sm:$0xff]  ;;  %v232_v52 = vld [vmem:[#allocation7 + $0x28] sm:$0xff]  ;;  %v233_v54 = vld [vmem:[#allocation7 + $0x30] sm:$0xff] }
  0x3f   :  { %512 = vmatprep.subr.bf16.mxu0 %v511_v8  ;;  %v543_v53 = vpack.c.bf16 %v232_v52, %v231_v51  ;;  %v234_v55 = vld [vmem:[#allocation7 + $0x38] sm:$0xff]  ;;  %v235_v57 = vld [vmem:[#allocation7 + $0x40] sm:$0xff]  ;;  %v236_v58 = vld [vmem:[#allocation7 + $0x48] sm:$0xff] }
  0x40   :  { %536 = vmatprep.subr.bf16.mxu1 %v535_v37  ;;  %v547_v56 = vpack.c.bf16 %v234_v55, %v233_v54  ;;  %v237_v59 = vld [vmem:[#allocation7 + $0x50] sm:$0xff]  ;;  %v551_v60 = vpack.c.bf16 %v236_v58, %v235_v57  ;;  %v238_v61 = vld [vmem:[#allocation7 + $0x58] sm:$0xff]  ;;  %v239_v63 = vld [vmem:[#allocation7 + $0x60] sm:$0xff] }
  0x41   :  { %538 = vmatpush3.bf16.msra.mxu1 %v535_v37  ;;  %v555_v62 = vpack.c.bf16 %v238_v61, %v237_v59  ;;  %v240_v0 = vld [vmem:[#allocation7 + $0x68] sm:$0xff]  ;;  %v241_v2 = vld [vmem:[#allocation7 + $0x70] sm:$0xff]  ;;  %v242_v3 = vld [vmem:[#allocation7 + $0x78] sm:$0xff] }
  0x42   :  { %514 = vmatpush3.bf16.msra.mxu0 %v511_v8  ;;  %540 = vmatprep.subr.bf16.mxu1 %v539_v50  ;;  %v559_v1 = vpack.c.bf16 %v240_v0, %v239_v63  ;;  %v563_v4 = vpack.c.bf16 %v242_v3, %v241_v2  ;;  %v392_v13 = vld [vmem:[%s846_s3] ss:$0 sm:$0xff] }
  0x43   :  { %516 = vmatprep.subr.bf16.mxu0 %v515_v12  ;;  %v395_v52 = vld [vmem:[%s850_s7] ss:$0 sm:$0xff]  ;;  %s647_s7 = scalar_lea.vmem %s379_s10, 256 }
  0x44   :  { %v396_v27 = vld [vmem:[%s851_s8] ss:$0 sm:$0xff]  ;;  %p648_p10 = scmp.ne.s32.totalorder %s379_s10, %s647_s7  ;;  %p653_p12 = scmp.lt.s32.totalorder %s647_s7, %s647_s7 }
  0x45   :  { %542 = vmatpush3.bf16.msra.mxu1 %v539_v50 }
  0x46   :  { %518 = vmatpush3.bf16.msra.mxu0 %v515_v12  ;;  %544 = vmatprep.subr.bf16.mxu1 %v543_v53  ;;  %p654_p13 = por %p653_p12, %p652_p11 }
  0x47   :  { %520 = vmatprep.subr.bf16.mxu0 %v519_v15 }
  0x48   :  { %p655_p0 = pnand %p654_p13, %p648_p10 }
  0x49   :  { %546 = vmatpush3.bf16.msra.mxu1 %v543_v53 }
  0x4a   :  { %522 = vmatpush3.bf16.msra.mxu0 %v519_v15  ;;  %548 = vmatprep.subr.bf16.mxu1 %v547_v56  ;;  %v393_v15 = vld [vmem:[%s847_s4] ss:$0 sm:$0xff] }
  0x4b   :  { %524 = vmatprep.subr.bf16.mxu0 %v523_v18 }
  0x4d   :  { %550 = vmatpush3.bf16.msra.mxu1 %v547_v56 }
  0x4e   :  { %526 = vmatpush3.bf16.msra.mxu0 %v523_v18  ;;  %552 = vmatprep.subr.bf16.mxu1 %v551_v60 }
  0x4f   :  { %528 = vmatprep.subr.bf16.mxu0 %v527_v21 }
  0x51   :  { %554 = vmatpush3.bf16.msra.mxu1 %v551_v60 }
  0x52   :  { %530 = vmatpush3.bf16.msra.mxu0 %v527_v21  ;;  %556 = vmatprep.subr.bf16.mxu1 %v555_v62 }
  0x53   :  { %532 = vmatprep.subr.bf16.mxu0 %v531_v24 }
  0x55   :  { %558 = vmatpush3.bf16.msra.mxu1 %v555_v62 }
  0x56   :  { %534 = vmatpush3.bf16.msra.mxu0 %v531_v24  ;;  %560 = vmatprep.subr.bf16.mxu1 %v559_v1 }
  0x59   :  { %466 = vmatmul.mubr.f32.vlgmr.msra.gmra.mrb[0].mxu0 %v786_v25  ;;  %562 = vmatpush3.bf16.msra.mxu1 %v559_v1 }
  0x5a   :  { %564 = vmatprep.subr.bf16.mxu1 %v563_v4 }
  0x5d   :  { %566 = vmatpush3.bf16.msra.mxu1 %v563_v4 }
 0x12c   :  { %v467_v29 = vpop.f32.mrb[0].mxu0 }
 0x12d   :  { %v165_v30 = vpop.f32.mrb[1].mxu0  ;;  %v171_v32 = vadd.f32 %v467_v29, %v391_v28 }
 0x12e   :  { %v166_v31 = vadd.f32 %v391_v28, %v165_v30  ;;  %v394_v28 = vld [vmem:[%s849_s6] ss:$0 sm:$0xff] }
 0x12f   :  { %v180_v34 = vsel %vm178_vm0, %v171_v32, 0.0 }
 0x130   :  { %v179_v33 = vsel %vm178_vm0, %v166_v31, 0.0 }
 0x131   :  { %181 = vadd.xlane.f32.xlu0 %v179_v33 }
 0x135   :  { %183 = vadd.xlane.f32.xlu0 %v180_v34 }
 0x1be   :  { %v182_v38 = vpop.xlane.xlu0 %181 }
 0x1bf   :  { %v185_v39 = vmul.f32 0.03125, %v182_v38 }
 0x1c1   :  { %v187_v40 = vsub.f32 %v166_v31, %v185_v39 }
 0x1c2   :  { %v184_v41 = vpop.xlane.xlu0 %183 }
 0x1c3   :  { %v186_v42 = vmul.f32 0.03125, %v184_v41  ;;  %v189_v43 = vsel %vm178_vm0, %v187_v40, 0.0 }
 0x1c4   :  { %v191_v44 = vmul.f32 %v189_v43, %v189_v43 }
 0x1c5   :  { %v188_v45 = vsub.f32 %v171_v32, %v186_v42 }
 0x1c6   :  { %193 = vadd.xlane.f32.xlu1 %v191_v44 }
 0x1c7   :  { %v190_v46 = vsel %vm178_vm0, %v188_v45, 0.0 }
 0x1c8   :  { %v192_v47 = vmul.f32 %v190_v46, %v190_v46 }
 0x1ca   :  { %195 = vadd.xlane.f32.xlu1 %v192_v47 }
 0x253   :  { %v194_v5 = vpop.xlane.xlu1 %193 }
 0x254   :  { %v197_v6 = vmul.f32 0.03125, %v194_v5 }
 0x256   :  { %v199_v7 = vadd.f32 1e-05, %v197_v6 }
 0x257   :  { %v196_v8 = vpop.xlane.xlu1 %195 }
 0x258   :  { %573 = vrsqrt.f32 %v199_v7  ;;  %v198_v10 = vmul.f32 0.03125, %v196_v8 }
 0x25a   :  { %v200_v11 = vadd.f32 1e-05, %v198_v10 }
 0x25c   :  { %575 = vrsqrt.f32 %v200_v11 }
 0x262   :  { %v574_v12 = vpop.eup %573 }
 0x263   :  { %v203_v14 = vmul.f32 %v574_v12, %v189_v43 }
 0x265   :  { %v211_v16 = vmul.f32 %v392_v13, %v203_v14 }
 0x266   :  { %v576_v17 = vpop.eup %575 }
 0x267   :  { %v219_v18 = vadd.f32 %v393_v15, %v211_v16  ;;  %v204_v19 = vmul.f32 %v576_v17, %v190_v46 }
 0x269   :  { %vm221_vm1 = vcmp.gt.f32.partialorder %v219_v18, 0.0  ;;  %v223_v20 = vmul.f32 0.01, %v219_v18  ;;  %v212_v21 = vmul.f32 %v392_v13, %v204_v19 }
 0x26b   :  { %v225_v22 = vsel %vm221_vm1, %v219_v18, %v223_v20  ;;  %v220_v23 = vadd.f32 %v393_v15, %v212_v21 }
 0x26c   :  { %500 = vmatprep.mubr.f32.mxu1 %v225_v22 }
 0x26d   :  { %vm222_vm2 = vcmp.gt.f32.partialorder %v220_v23, 0.0  ;;  %v224_v24 = vmul.f32 0.01, %v220_v23 }
 0x26f   :  { %v226_v26 = vsel %vm222_vm2, %v220_v23, %v224_v24 }
 0x270   :  { %501 = vmatmul.mubr.f32.vlgmr.msra.gmra.mrb[0].mxu1 %v226_v26 }
 0x343   :  { %v502_v29 = vpop.f32.mrb[0].mxu1 }
 0x344   :  { %v322_v30 = vadd.f32 %v502_v29, %v394_v28  ;;  %v316_v31 = vpop.f32.mrb[1].mxu1 }
 0x345   :  { %v317_v32 = vadd.f32 %v394_v28, %v316_v31 }
 0x346   :  { %v328_v33 = vsel %vm178_vm0, %v322_v30, 0.0 }
 0x347   :  { %331 = vadd.xlane.f32.xlu1 %v328_v33  ;;  %v327_v34 = vsel %vm178_vm0, %v317_v32, 0.0 }
 0x348   :  { %329 = vadd.xlane.f32.xlu0 %v327_v34 }
 0x3d4   :  { %v332_v35 = vpop.xlane.xlu1 %331 }
 0x3d5   :  { %v334_v36 = vmul.f32 0.03125, %v332_v35  ;;  %v330_v37 = vpop.xlane.xlu0 %329 }
 0x3d6   :  { %v333_v38 = vmul.f32 0.03125, %v330_v37 }
 0x3d7   :  { %v336_v39 = vsub.f32 %v322_v30, %v334_v36 }
 0x3d8   :  { %v335_v40 = vsub.f32 %v317_v32, %v333_v38 }
 0x3d9   :  { %v338_v41 = vsel %vm178_vm0, %v336_v39, 0.0 }
 0x3da   :  { %v340_v42 = vmul.f32 %v338_v41, %v338_v41  ;;  %v337_v43 = vsel %vm178_vm0, %v335_v40, 0.0 }
 0x3db   :  { %v339_v44 = vmul.f32 %v337_v43, %v337_v43 }
 0x3dc   :  { %343 = vadd.xlane.f32.xlu1 %v340_v42 }
 0x3dd   :  { %341 = vadd.xlane.f32.xlu0 %v339_v44 }
 0x469   :  { %v344_v45 = vpop.xlane.xlu1 %343 }
 0x46a   :  { %v346_v46 = vmul.f32 0.03125, %v344_v45  ;;  %v342_v47 = vpop.xlane.xlu0 %341 }
 0x46b   :  { %v345_v48 = vmul.f32 0.03125, %v342_v47 }
 0x46c   :  { %v348_v49 = vadd.f32 1e-05, %v346_v46 }
 0x46d   :  { %v347_v50 = vadd.f32 1e-05, %v345_v48 }
 0x46e   :  { %577 = vrsqrt.f32 %v348_v49 }
 0x46f   :  { %579 = vrsqrt.f32 %v347_v50 }
 0x478   :  { %v578_v51 = vpop.eup %577 }
 0x479   :  { %v580_v53 = vpop.eup %579  ;;  %v352_v54 = vmul.f32 %v578_v51, %v338_v41 }
 0x47a   :  { %v351_v55 = vmul.f32 %v580_v53, %v337_v43 }
 0x47b   :  { %v360_v56 = vmul.f32 %v395_v52, %v352_v54 }
 0x47c   :  { %v359_v57 = vmul.f32 %v395_v52, %v351_v55 }
 0x47d   :  { %v368_v58 = vadd.f32 %v396_v27, %v360_v56 }
 0x47e   :  { %v367_v59 = vadd.f32 %v396_v27, %v359_v57 }
 0x47f   :  { %v370_v60 = vadd.f32 %v368_v58, %v786_v25 }
 0x480   :  { %v369_v61 = vadd.f32 %v367_v59, %v783_v9 }
 0x481   :  { %372 = vst [vmem:[#allocation8 + $0x8] sm:$0xff] %v370_v60 }
 0x482   :  { %371 = vst [vmem:[#allocation8] sm:$0xff] %v369_v61 }
 0x483   :  { %658 = shalt.err (!%p655_p0)
}
 0x484   :  { %s659_s15 = scalar_lea.hbm %s852_s9, 256 }
 0x485   :  { %p660_p1 = scmp.ne.s32.totalorder %s852_s9, %s659_s15  ;;  %p663_p2 = scmp.lt.u32.totalorder %s659_s15, %s852_s9 }
 0x487   :  { %p665_p3 = pnand %p663_p2, %p660_p1 }
 0x489   :  { %668 = shalt.err (!%p665_p3)
}
 0x48a   :  { %384 = dma.vmem_to_hbm [thread:$0]  %s379_s10, 256, %s852_s9, [#allocation4], %s677_s21, %s677_s21, %s678_s22  }
 0x48b   :  { %673 = dma.done.wait [#allocation4], 256  }
 0x48c   :  { %674 = vsyncadd [#allocation4], 4294967040 }
 0x48d   :  { %388 = vsyncpa [#allocation3], 1 }
 0x48e   :  { %389 = vsyncpa [#allocation6], 1 }
 0x48f   :  { %390 = vsyncpa [#allocation4], 1 }

// kernel: tpu_custom_call.1
= control target key start
LH: loop header
LB: loop body
LE: loop exit
PB: predicated region body
PF: predicated region fallthrough
CT: control target
= control target key end

     0   :  { %14 = vsyncpa [#allocation3], 0  ;;  %s843_s0 = inlined_call_operand.hbm [shape: f32[16,128], index: 0, kind: input, shape index: {}]   ;;  %s844_s1 = inlined_call_operand.hbm [shape: f32[128,128], index: 1, kind: input, shape index: {}]   ;;  %s845_s2 = inlined_call_operand.vmem [shape: f32[1,128], index: 2, kind: input, shape index: {}]   ;;  %s846_s3 = inlined_call_operand.vmem [shape: f32[1,128], index: 3, kind: input, shape index: {}]   ;;  %s847_s4 = inlined_call_operand.vmem [shape: f32[1,128], index: 4, kind: input, shape index: {}]   ;;  %s848_s5 = inlined_call_operand.hbm [shape: f32[128,128], index: 5, kind: input, shape index: {}]   ;;  %s849_s6 = inlined_call_operand.vmem [shape: f32[1,128], index: 6, kind: input, shape index: {}]   ;;  %s850_s7 = inlined_call_operand.vmem [shape: f32[1,128], index: 7, kind: input, shape index: {}]   ;;  %s851_s8 = inlined_call_operand.vmem [shape: f32[1,128], index: 8, kind: input, shape index: {}]   ;;  %s852_s9 = inlined_call_operand.hbm [shape: f32[16,128], index: 9, kind: output, shape index: {}]  }
   0x1   :  { %15 = vsyncpa [#allocation6], 0 }
   0x2   :  { %16 = vsyncpa [#allocation4], 0  ;;  %s675_s30 = smov [#allocation5]   ;;  %s676_s11 = smov [#allocation2]  }
   0x3   :  { %s34_s10 = sshll.u32 %s675_s30, 4  ;;  %s22_s12 = sshll.u32 %s676_s11, 4  ;;  %s35_s10 = int_to_ptr.vmem [resolvable:$true] %s34_s10  ;;  %s731_s12 = int_to_ptr.vmem [resolvable:$true] %s22_s12 }
   0x4   :  { %s581_s15 = scalar_lea.hbm %s844_s1, 2048 }
   0x5   :  { %p582_p0 = scmp.ne.s32.totalorder %s844_s1, %s581_s15  ;;  %p585_p1 = scmp.lt.u32.totalorder %s581_s15, %s844_s1 }
   0x7   :  { %p587_p2 = pnand %p585_p1, %p582_p0 }
   0x9   :  { %590 = shalt.err (!%p587_p2)
}
   0xa   :  { %s591_s20 = scalar_lea.vmem %s35_s10, 2048  ;;  %p596_p4 = scmp.lt.s32.totalorder %s35_s10, %s35_s10 }
   0xb   :  { %p592_p3 = scmp.ne.s32.totalorder %s35_s10, %s591_s20  ;;  %p597_p5 = scmp.lt.s32.totalorder %s591_s20, %s591_s20 }
   0xd   :  { %p598_p6 = por %p597_p5, %p596_p4 }
   0xf   :  { %p599_p7 = pnand %p598_p6, %p592_p3 }
  0x11   :  { %602 = shalt.err (!%p599_p7)
}
  0x12   :  { %s677_s21 = smov 128   ;;  %s678_s22 = smov 8  }
  0x13   :  { %40 = dma.hbm_to_vmem [thread:$0]  %s844_s1, 2048, %s35_s10, [#allocation6], %s677_s21, %s677_s21, %s678_s22  }
  0x14   :  { %s603_s27 = scalar_lea.hbm %s843_s0, 256 }
  0x15   :  { %p604_p8 = scmp.ne.s32.totalorder %s843_s0, %s603_s27  ;;  %p607_p9 = scmp.lt.u32.totalorder %s603_s27, %s843_s0 }
  0x17   :  { %p609_p10 = pnand %p607_p9, %p604_p8 }
  0x19   :  { %612 = shalt.err (!%p609_p10)
}
  0x1a   :  { %s613_s13 = scalar_lea.vmem %s731_s12, 256  ;;  %p618_p12 = scmp.lt.s32.totalorder %s731_s12, %s731_s12 }
  0x1b   :  { %p614_p11 = scmp.ne.s32.totalorder %s731_s12, %s613_s13  ;;  %p619_p13 = scmp.lt.s32.totalorder %s613_s13, %s613_s13 }
  0x1d   :  { %p620_p0 = por %p619_p13, %p618_p12 }
  0x1f   :  { %p621_p1 = pnand %p620_p0, %p614_p11 }
  0x21   :  { %624 = shalt.err (!%p621_p1)
}
  0x22   :  { %28 = dma.hbm_to_vmem [thread:$0]  %s843_s0, 256, %s731_s12, [#allocation3], %s677_s21, %s677_s21, %s678_s22  }
  0x23   :  { %s679_s14 = smov [#allocation7]   ;;  %s625_s18 = scalar_lea.hbm %s848_s5, 2048 }
  0x24   :  { %s52_s15 = sshll.u32 %s679_s14, 4  ;;  %p626_p2 = scmp.ne.s32.totalorder %s848_s5, %s625_s18  ;;  %s53_s15 = int_to_ptr.vmem [resolvable:$true] %s52_s15 }
  0x25   :  { %p629_p3 = scmp.lt.u32.totalorder %s625_s18, %s848_s5 }
  0x27   :  { %p631_p4 = pnand %p629_p3, %p626_p2 }
  0x29   :  { %634 = shalt.err (!%p631_p4)
}
  0x2a   :  { %s635_s25 = scalar_lea.vmem %s53_s15, 2048  ;;  %p640_p6 = scmp.lt.s32.totalorder %s53_s15, %s53_s15 }
  0x2b   :  { %p636_p5 = scmp.ne.s32.totalorder %s53_s15, %s635_s25  ;;  %p641_p7 = scmp.lt.s32.totalorder %s635_s25, %s635_s25 }
  0x2d   :  { %p642_p8 = por %p641_p7, %p640_p6 }
  0x2f   :  { %p643_p9 = pnand %p642_p8, %p636_p5 }
  0x31   :  { %646 = shalt.err (!%p643_p9)
}
  0x32   :  { %58 = dma.hbm_to_vmem [thread:$0]  %s848_s5, 2048, %s53_s15, [#allocation6], %s677_s21, %s677_s21, %s678_s22  }
  0x33   :  { %669 = dma.done.wait [#allocation3], 256  }
  0x34   :  { %670 = vsyncadd [#allocation3], 4294967040 }
  0x35   :  { %671 = dma.done.wait [#allocation6], 4096  }
  0x36   :  { %672 = vsyncadd [#allocation6], 4294963200  ;;  %v76_v0 = vld [vmem:[#allocation5] sm:$0xff]  ;;  %v77_v1 = vld [vmem:[#allocation5 + $0x8] sm:$0xff]  ;;  %v176_v26 = vlaneseq  ;;  %s680_s1 = smov [#allocation8]  }
  0x37   :  { %v78_v2 = vld [vmem:[#allocation5 + $0x10] sm:$0xff]  ;;  %v503_v3 = vpack.c.bf16 %v77_v1, %v76_v0  ;;  %v79_v4 = vld [vmem:[#allocation5 + $0x18] sm:$0xff]  ;;  %v80_v6 = vld [vmem:[#allocation5 + $0x20] sm:$0xff]  ;;  %s378_s10 = sshll.u32 %s680_s1, 4  ;;  %s379_s10 = int_to_ptr.vmem [resolvable:$true] %s378_s10 }
  0x38   :  { %v507_v5 = vpack.c.bf16 %v79_v4, %v78_v2  ;;  %v81_v7 = vld [vmem:[#allocation5 + $0x28] sm:$0xff]  ;;  %v783_v9 = vld [vmem:[#allocation2] sm:$0xff]  ;;  %v83_v11 = vld [vmem:[#allocation5 + $0x38] sm:$0xff]  ;;  %v789_v27 = vand.u32 127, %v176_v26  ;;  %p652_p11 = scmp.lt.s32.totalorder %s379_s10, %s379_s10 }
  0x39   :  { %504 = vmatprep.subr.bf16.mxu0 %v503_v3  ;;  %v511_v8 = vpack.c.bf16 %v81_v7, %v80_v6  ;;  %v82_v10 = vld [vmem:[#allocation5 + $0x30] sm:$0xff]  ;;  %465 = vmatprep.mubr.f32.mxu0 %v783_v9  ;;  %v84_v13 = vld [vmem:[#allocation5 + $0x40] sm:$0xff]  ;;  %v85_v14 = vld [vmem:[#allocation5 + $0x48] sm:$0xff] }
  0x3a   :  { %506 = vmatpush3.bf16.msra.mxu0 %v503_v3  ;;  %v515_v12 = vpack.c.bf16 %v83_v11, %v82_v10  ;;  %v519_v15 = vpack.c.bf16 %v85_v14, %v84_v13  ;;  %v86_v16 = vld [vmem:[#allocation5 + $0x50] sm:$0xff]  ;;  %v87_v17 = vld [vmem:[#allocation5 + $0x58] sm:$0xff]  ;;  %v88_v19 = vld [vmem:[#allocation5 + $0x60] sm:$0xff]  ;;  %vm178_vm0 = vcmp.lt.s32.totalorder %v789_v27, 32 }
  0x3b   :  { %508 = vmatprep.subr.bf16.mxu0 %v507_v5  ;;  %v523_v18 = vpack.c.bf16 %v87_v17, %v86_v16  ;;  %v89_v20 = vld [vmem:[#allocation5 + $0x68] sm:$0xff]  ;;  %v90_v22 = vld [vmem:[#allocation5 + $0x70] sm:$0xff]  ;;  %v91_v23 = vld [vmem:[#allocation5 + $0x78] sm:$0xff] }
  0x3c   :  { %v527_v21 = vpack.c.bf16 %v89_v20, %v88_v19  ;;  %v531_v24 = vpack.c.bf16 %v91_v23, %v90_v22  ;;  %v786_v25 = vld [vmem:[#allocation2 + $0x8] sm:$0xff]  ;;  %v391_v28 = vld [vmem:[%s845_s2] ss:$0 sm:$0xff]  ;;  %v227_v35 = vld [vmem:[#allocation7] sm:$0xff] }
  0x3d   :  { %v228_v36 = vld [vmem:[#allocation7 + $0x8] sm:$0xff]  ;;  %v229_v48 = vld [vmem:[#allocation7 + $0x10] sm:$0xff]  ;;  %v230_v49 = vld [vmem:[#allocation7 + $0x18] sm:$0xff] }
  0x3e   :  { %510 = vmatpush3.bf16.msra.mxu0 %v507_v5  ;;  %v535_v37 = vpack.c.bf16 %v228_v36, %v227_v35  ;;  %v539_v50 = vpack.c.bf16 %v230_v49, %v229_v48  ;;  %v231_v51 = vld [vmem:[#allocation7 + $0x20] sm:$0xff]  ;;  %v232_v52 = vld [vmem:[#allocation7 + $0x28] sm:$0xff]  ;;  %v233_v54 = vld [vmem:[#allocation7 + $0x30] sm:$0xff] }
  0x3f   :  { %512 = vmatprep.subr.bf16.mxu0 %v511_v8  ;;  %v543_v53 = vpack.c.bf16 %v232_v52, %v231_v51  ;;  %v234_v55 = vld [vmem:[#allocation7 + $0x38] sm:$0xff]  ;;  %v235_v57 = vld [vmem:[#allocation7 + $0x40] sm:$0xff]  ;;  %v236_v58 = vld [vmem:[#allocation7 + $0x48] sm:$0xff] }
  0x40   :  { %536 = vmatprep.subr.bf16.mxu1 %v535_v37  ;;  %v547_v56 = vpack.c.bf16 %v234_v55, %v233_v54  ;;  %v237_v59 = vld [vmem:[#allocation7 + $0x50] sm:$0xff]  ;;  %v551_v60 = vpack.c.bf16 %v236_v58, %v235_v57  ;;  %v238_v61 = vld [vmem:[#allocation7 + $0x58] sm:$0xff]  ;;  %v239_v63 = vld [vmem:[#allocation7 + $0x60] sm:$0xff] }
  0x41   :  { %538 = vmatpush3.bf16.msra.mxu1 %v535_v37  ;;  %v555_v62 = vpack.c.bf16 %v238_v61, %v237_v59  ;;  %v240_v0 = vld [vmem:[#allocation7 + $0x68] sm:$0xff]  ;;  %v241_v2 = vld [vmem:[#allocation7 + $0x70] sm:$0xff]  ;;  %v242_v3 = vld [vmem:[#allocation7 + $0x78] sm:$0xff] }
  0x42   :  { %514 = vmatpush3.bf16.msra.mxu0 %v511_v8  ;;  %540 = vmatprep.subr.bf16.mxu1 %v539_v50  ;;  %v559_v1 = vpack.c.bf16 %v240_v0, %v239_v63  ;;  %v563_v4 = vpack.c.bf16 %v242_v3, %v241_v2  ;;  %v392_v13 = vld [vmem:[%s846_s3] ss:$0 sm:$0xff] }
  0x43   :  { %516 = vmatprep.subr.bf16.mxu0 %v515_v12  ;;  %v395_v52 = vld [vmem:[%s850_s7] ss:$0 sm:$0xff]  ;;  %s647_s7 = scalar_lea.vmem %s379_s10, 256 }
  0x44   :  { %v396_v27 = vld [vmem:[%s851_s8] ss:$0 sm:$0xff]  ;;  %p648_p10 = scmp.ne.s32.totalorder %s379_s10, %s647_s7  ;;  %p653_p12 = scmp.lt.s32.totalorder %s647_s7, %s647_s7 }
  0x45   :  { %542 = vmatpush3.bf16.msra.mxu1 %v539_v50 }
  0x46   :  { %518 = vmatpush3.bf16.msra.mxu0 %v515_v12  ;;  %544 = vmatprep.subr.bf16.mxu1 %v543_v53  ;;  %p654_p13 = por %p653_p12, %p652_p11 }
  0x47   :  { %520 = vmatprep.subr.bf16.mxu0 %v519_v15 }
  0x48   :  { %p655_p0 = pnand %p654_p13, %p648_p10 }
  0x49   :  { %546 = vmatpush3.bf16.msra.mxu1 %v543_v53 }
  0x4a   :  { %522 = vmatpush3.bf16.msra.mxu0 %v519_v15  ;;  %548 = vmatprep.subr.bf16.mxu1 %v547_v56  ;;  %v393_v15 = vld [vmem:[%s847_s4] ss:$0 sm:$0xff] }
  0x4b   :  { %524 = vmatprep.subr.bf16.mxu0 %v523_v18 }
  0x4d   :  { %550 = vmatpush3.bf16.msra.mxu1 %v547_v56 }
  0x4e   :  { %526 = vmatpush3.bf16.msra.mxu0 %v523_v18  ;;  %552 = vmatprep.subr.bf16.mxu1 %v551_v60 }
  0x4f   :  { %528 = vmatprep.subr.bf16.mxu0 %v527_v21 }
  0x51   :  { %554 = vmatpush3.bf16.msra.mxu1 %v551_v60 }
  0x52   :  { %530 = vmatpush3.bf16.msra.mxu0 %v527_v21  ;;  %556 = vmatprep.subr.bf16.mxu1 %v555_v62 }
  0x53   :  { %532 = vmatprep.subr.bf16.mxu0 %v531_v24 }
  0x55   :  { %558 = vmatpush3.bf16.msra.mxu1 %v555_v62 }
  0x56   :  { %534 = vmatpush3.bf16.msra.mxu0 %v531_v24  ;;  %560 = vmatprep.subr.bf16.mxu1 %v559_v1 }
  0x59   :  { %466 = vmatmul.mubr.f32.vlgmr.msra.gmra.mrb[0].mxu0 %v786_v25  ;;  %562 = vmatpush3.bf16.msra.mxu1 %v559_v1 }
  0x5a   :  { %564 = vmatprep.subr.bf16.mxu1 %v563_v4 }
  0x5d   :  { %566 = vmatpush3.bf16.msra.mxu1 %v563_v4 }
 0x12c   :  { %v467_v29 = vpop.f32.mrb[0].mxu0 }
 0x12d   :  { %v165_v30 = vpop.f32.mrb[1].mxu0  ;;  %v171_v32 = vadd.f32 %v467_v29, %v391_v28 }
 0x12e   :  { %v166_v31 = vadd.f32 %v391_v28, %v165_v30  ;;  %v394_v28 = vld [vmem:[%s849_s6] ss:$0 sm:$0xff] }
 0x12f   :  { %v180_v34 = vsel %vm178_vm0, %v171_v32, 0.0 }
 0x130   :  { %v179_v33 = vsel %vm178_vm0, %v166_v31, 0.0 }
 0x131   :  { %181 = vadd.xlane.f32.xlu0 %v179_v33 }
 0x135   :  { %183 = vadd.xlane.f32.xlu0 %v180_v34 }
 0x1be   :  { %v182_v38 = vpop.xlane.xlu0 %181 }
 0x1bf   :  { %v185_v39 = vmul.f32 0.03125, %v182_v38 }
 0x1c1   :  { %v187_v40 = vsub.f32 %v166_v31, %v185_v39 }
 0x1c2   :  { %v184_v41 = vpop.xlane.xlu0 %183 }
 0x1c3   :  { %v186_v42 = vmul.f32 0.03125, %v184_v41  ;;  %v189_v43 = vsel %vm178_vm0, %v187_v40, 0.0 }
 0x1c4   :  { %v191_v44 = vmul.f32 %v189_v43, %v189_v43 }
 0x1c5   :  { %v188_v45 = vsub.f32 %v171_v32, %v186_v42 }
 0x1c6   :  { %193 = vadd.xlane.f32.xlu1 %v191_v44 }
 0x1c7   :  { %v190_v46 = vsel %vm178_vm0, %v188_v45, 0.0 }
 0x1c8   :  { %v192_v47 = vmul.f32 %v190_v46, %v190_v46 }
 0x1ca   :  { %195 = vadd.xlane.f32.xlu1 %v192_v47 }
 0x253   :  { %v194_v5 = vpop.xlane.xlu1 %193 }
 0x254   :  { %v197_v6 = vmul.f32 0.03125, %v194_v5 }
 0x256   :  { %v199_v7 = vadd.f32 1e-05, %v197_v6 }
 0x257   :  { %v196_v8 = vpop.xlane.xlu1 %195 }
 0x258   :  { %573 = vrsqrt.f32 %v199_v7  ;;  %v198_v10 = vmul.f32 0.03125, %v196_v8 }
 0x25a   :  { %v200_v11 = vadd.f32 1e-05, %v198_v10 }
 0x25c   :  { %575 = vrsqrt.f32 %v200_v11 }
 0x262   :  { %v574_v12 = vpop.eup %573 }
 0x263   :  { %v203_v14 = vmul.f32 %v574_v12, %v189_v43 }
 0x265   :  { %v211_v16 = vmul.f32 %v392_v13, %v203_v14 }
 0x266   :  { %v576_v17 = vpop.eup %575 }
 0x267   :  { %v219_v18 = vadd.f32 %v393_v15, %v211_v16  ;;  %v204_v19 = vmul.f32 %v576_v17, %v190_v46 }
 0x269   :  { %vm221_vm1 = vcmp.gt.f32.partialorder %v219_v18, 0.0  ;;  %v223_v20 = vmul.f32 0.01, %v219_v18  ;;  %v212_v21 = vmul.f32 %v392_v13, %v204_v19 }
 0x26b   :  { %v225_v22 = vsel %vm221_vm1, %v219_v18, %v223_v20  ;;  %v220_v23 = vadd.f32 %v393_v15, %v212_v21 }
 0x26c   :  { %500 = vmatprep.mubr.f32.mxu1 %v225_v22 }
 0x26d   :  { %vm222_vm2 = vcmp.gt.f32.partialorder %v220_v23, 0.0  ;;  %v224_v24 = vmul.f32 0.01, %v220_v23 }
 0x26f   :  { %v226_v26 = vsel %vm222_vm2, %v220_v23, %v224_v24 }
 0x270   :  { %501 = vmatmul.mubr.f32.vlgmr.msra.gmra.mrb[0].mxu1 %v226_v26 }
 0x343   :  { %v502_v29 = vpop.f32.mrb[0].mxu1 }
 0x344   :  { %v322_v30 = vadd.f32 %v502_v29, %v394_v28  ;;  %v316_v31 = vpop.f32.mrb[1].mxu1 }
 0x345   :  { %v317_v32 = vadd.f32 %v394_v28, %v316_v31 }
 0x346   :  { %v328_v33 = vsel %vm178_vm0, %v322_v30, 0.0 }
 0x347   :  { %331 = vadd.xlane.f32.xlu1 %v328_v33  ;;  %v327_v34 = vsel %vm178_vm0, %v317_v32, 0.0 }
 0x348   :  { %329 = vadd.xlane.f32.xlu0 %v327_v34 }
 0x3d4   :  { %v332_v35 = vpop.xlane.xlu1 %331 }
 0x3d5   :  { %v334_v36 = vmul.f32 0.03125, %v332_v35  ;;  %v330_v37 = vpop.xlane.xlu0 %329 }
 0x3d6   :  { %v333_v38 = vmul.f32 0.03125, %v330_v37 }
 0x3d7   :  { %v336_v39 = vsub.f32 %v322_v30, %v334_v36 }
 0x3d8   :  { %v335_v40 = vsub.f32 %v317_v32, %v333_v38 }
 0x3d9   :  { %v338_v41 = vsel %vm178_vm0, %v336_v39, 0.0 }
 0x3da   :  { %v340_v42 = vmul.f32 %v338_v41, %v338_v41  ;;  %v337_v43 = vsel %vm178_vm0, %v335_v40, 0.0 }
 0x3db   :  { %v339_v44 = vmul.f32 %v337_v43, %v337_v43 }
 0x3dc   :  { %343 = vadd.xlane.f32.xlu1 %v340_v42 }
 0x3dd   :  { %341 = vadd.xlane.f32.xlu0 %v339_v44 }
 0x469   :  { %v344_v45 = vpop.xlane.xlu1 %343 }
 0x46a   :  { %v346_v46 = vmul.f32 0.03125, %v344_v45  ;;  %v342_v47 = vpop.xlane.xlu0 %341 }
 0x46b   :  { %v345_v48 = vmul.f32 0.03125, %v342_v47 }
 0x46c   :  { %v348_v49 = vadd.f32 1e-05, %v346_v46 }
 0x46d   :  { %v347_v50 = vadd.f32 1e-05, %v345_v48 }
 0x46e   :  { %577 = vrsqrt.f32 %v348_v49 }
 0x46f   :  { %579 = vrsqrt.f32 %v347_v50 }
 0x478   :  { %v578_v51 = vpop.eup %577 }
 0x479   :  { %v580_v53 = vpop.eup %579  ;;  %v352_v54 = vmul.f32 %v578_v51, %v338_v41 }
 0x47a   :  { %v351_v55 = vmul.f32 %v580_v53, %v337_v43 }
 0x47b   :  { %v360_v56 = vmul.f32 %v395_v52, %v352_v54 }
 0x47c   :  { %v359_v57 = vmul.f32 %v395_v52, %v351_v55 }
 0x47d   :  { %v368_v58 = vadd.f32 %v396_v27, %v360_v56 }
 0x47e   :  { %v367_v59 = vadd.f32 %v396_v27, %v359_v57 }
 0x47f   :  { %v370_v60 = vadd.f32 %v368_v58, %v786_v25 }
 0x480   :  { %v369_v61 = vadd.f32 %v367_v59, %v783_v9 }
 0x481   :  { %372 = vst [vmem:[#allocation8 + $0x8] sm:$0xff] %v370_v60 }
 0x482   :  { %371 = vst [vmem:[#allocation8] sm:$0xff] %v369_v61 }
 0x483   :  { %658 = shalt.err (!%p655_p0)
}
 0x484   :  { %s659_s15 = scalar_lea.hbm %s852_s9, 256 }
 0x485   :  { %p660_p1 = scmp.ne.s32.totalorder %s852_s9, %s659_s15  ;;  %p663_p2 = scmp.lt.u32.totalorder %s659_s15, %s852_s9 }
 0x487   :  { %p665_p3 = pnand %p663_p2, %p660_p1 }
 0x489   :  { %668 = shalt.err (!%p665_p3)
}
 0x48a   :  { %384 = dma.vmem_to_hbm [thread:$0]  %s379_s10, 256, %s852_s9, [#allocation4], %s677_s21, %s677_s21, %s678_s22  }
 0x48b   :  { %673 = dma.done.wait [#allocation4], 256  }
 0x48c   :  { %674 = vsyncadd [#allocation4], 4294967040 }
 0x48d   :  { %388 = vsyncpa [#allocation3], 1 }
 0x48e   :  { %389 = vsyncpa [#allocation6], 1 }
 0x48f   :  { %390 = vsyncpa [#allocation4], 1 }

</bundles_post_ra>
